<compile_context>
chip_gen: v6e
topology: v6e:2x2x1
jax: 0.10.0
libtpu: 0.0.40
codegen_flags: <defaults>
</compile_context>

<pallas_src>
import functools
from types import SimpleNamespace

import jax
import jax.numpy as jnp
from jax.experimental import pallas as pl
from jax.experimental.pallas import tpu as pltpu


def _masked_mean_kernel(mask_ref, *refs, num_hidden: int, scale: float):
    """One (batch-tile, seq-tile) grid step of the masked mean.

    mask_ref : (tb, 1, ts)    attention-mask tile (int or float dtype)
    refs     : num_hidden x (tb, ts, H) hidden tiles,
               out_ref (tb, 1, H),
               acc_ref (tb, 1, H) f32 scratch, cnt_ref (tb, 1, 1) f32 scratch.
    """
    out_ref = refs[num_hidden]
    acc_ref = refs[num_hidden + 1]
    cnt_ref = refs[num_hidden + 2]

    s = pl.program_id(1)

    @pl.when(s == 0)
    def _init():
        acc_ref[...] = jnp.zeros_like(acc_ref)
        cnt_ref[...] = jnp.zeros_like(cnt_ref)

    h = refs[0][...]
    if num_hidden == 2:
        # Add the two layers in their native dtype; the MXU accumulates in f32.
        h = h + refs[1][...]

    mask = mask_ref[...]                                       # (tb, 1, ts)

    # Token count for this sequence tile (f32 keeps integer counts exact).
    cnt_ref[...] += jnp.sum(mask.astype(jnp.float32), axis=-1, keepdims=True)

    # Masked sum over the sequence as a batched (1, ts) x (ts, H) contraction
    # on the otherwise-idle MXU with f32 accumulation.  Avoids materializing
    # an f32 copy of the hidden tile; compute stays hidden under the HBM DMA.
    acc_ref[...] += jnp.einsum(
        'bqs,bsh->bqh', mask.astype(h.dtype), h,
        preferred_element_type=jnp.float32)

    @pl.when(s == pl.num_programs(1) - 1)
    def _finalize():
        # Exact per-row reciprocal (only (tb, 1, 1) values -> effectively free).
        # Rows with an all-zero mask give inf/NaN, matching the PyTorch
        # reference's divide-by-zero semantics.
        inv = scale / cnt_ref[...]
        out_ref[...] = (acc_ref[...] * inv).astype(out_ref.dtype)


def _pick_tile(dim: int, target: int, align: int) -> int:
    """Largest multiple of `align` dividing `dim` that is <= target (and
    >= align); falls back to the full dim when no such divisor exists."""
    if dim % align != 0 or dim <= align:
        return dim
    t = min(dim, max(align, (target // align) * align))
    while dim % t != 0:
        t -= align
    return t


def _pick_batch_tile(B: int) -> int:
    """Batch tile: prefer 16-row alignment, <= 64 rows, and >= 2 blocks along
    the parallel batch axis so both v7x TensorCores get work."""
    if B < 16:
        return B
    target = min(64, B // 2)
    for align in (16, 8):
        if B % align == 0 and target >= align:
            return _pick_tile(B, target, align)
    return B


def masked_mean_pool(attention_mask, hiddens, *, halve: bool = False):
    """attention_mask: (B, S); hiddens: tuple of 1 or 2 (B, S, H) arrays -> (B, H)."""
    num_hidden = len(hiddens)
    assert num_hidden in (1, 2)
    B, S, H = hiddens[0].shape
    assert attention_mask.shape == (B, S)
    dtype = hiddens[0].dtype
    itemsize = jnp.dtype(dtype).itemsize

    # ---- Tiling: full-H contiguous rows; tile batch and sequence. ----------
    tb = _pick_batch_tile(B)

    # Per-hidden-tile byte budget (each tile is double-buffered by the
    # pipeline).  Large enough to amortize the ~0.35 us per-step overhead,
    # small enough that the total footprint stays well under 48 MiB.
    per_hidden_budget = (12 << 20) if num_hidden == 1 else (8 << 20)

    # ts is the lane dim of the mask block and the sublane dim of the hidden
    # block, so it must be a multiple of 128 dividing S (or the full S).
    if S % 128 == 0:
        ts_target = max(128, per_hidden_budget // max(1, tb * H * itemsize))
        ts = _pick_tile(S, ts_target, 128)
    else:
        ts = S
    # If the block is still over budget (ts floored at 128 / full S), shrink
    # the batch tile instead (tb carries no (8,128) layout constraint).
    while tb * ts * H * itemsize > per_hidden_budget and tb % 2 == 0:
        tb //= 2

    grid = (B // tb, S // ts)

    # Explicit, generation-aware VMEM limit: 2 buffers x (hiddens + mask +
    # out) + accumulators, capped at 48 MiB (v7x physical VMEM is 64 MiB;
    # v5e's 16 MiB default scoped limit is below what these tiles need).
    mask_itemsize = jnp.dtype(attention_mask.dtype).itemsize
    need = (2 * (num_hidden * tb * ts * H * itemsize
                 + tb * ts * mask_itemsize
                 + tb * H * itemsize)
            + tb * (H + 128) * 4)
    vmem_limit = int(min(max(need + (4 << 20), 32 << 20), 48 << 20))

    kernel = functools.partial(
        _masked_mean_kernel, num_hidden=num_hidden, scale=0.5 if halve else 1.0)

    mask3 = attention_mask.reshape(B, 1, S)          # lane dim = sequence
    in_specs = [pl.BlockSpec((tb, 1, ts), lambda i, s: (i, 0, s))]
    in_specs += [pl.BlockSpec((tb, ts, H), lambda i, s: (i, s, 0))
                 for _ in range(num_hidden)]
    # Same output block for every seq step -> stays resident in VMEM and is
    # stored once, H-wide (lane dense).
    out_spec = pl.BlockSpec((tb, 1, H), lambda i, s: (i, 0, 0))

    out = pl.pallas_call(
        kernel,
        out_shape=jax.ShapeDtypeStruct((B, 1, H), dtype),
        grid_spec=pltpu.PrefetchScalarGridSpec(
            num_scalar_prefetch=0,
            grid=grid,
            in_specs=in_specs,
            out_specs=out_spec,
            scratch_shapes=[pltpu.VMEM((tb, 1, H), jnp.float32),
                            pltpu.VMEM((tb, 1, 1), jnp.float32)],
        ),
        compiler_params=pltpu.CompilerParams(
            dimension_semantics=("parallel", "arbitrary"),
            vmem_limit_bytes=vmem_limit),
    )(mask3, *hiddens)
    return out.reshape(B, H)


class Pooler:
    """JAX/Pallas port of simcse.models.Pooler (parameter-free)."""

    _TYPES = ('cls', 'cls_before_pooler', 'avg', 'avg_top2', 'avg_first_last')

    def __init__(self, pooler_type):
        assert pooler_type in self._TYPES, 'unrecognized pooling type %s' % pooler_type
        self.pooler_type = pooler_type

    def __call__(self, attention_mask, outputs):
        last_hidden = outputs.last_hidden_state
        hidden_states = outputs.hidden_states
        if self.pooler_type in ('cls', 'cls_before_pooler'):
            # Pure [CLS] slice — indexing only, no compute to put in a kernel.
            return last_hidden[:, 0]
        if self.pooler_type == 'avg':
            return masked_mean_pool(attention_mask, (last_hidden,))
        if self.pooler_type == 'avg_first_last':
            return masked_mean_pool(
                attention_mask, (hidden_states[0], hidden_states[-1]), halve=True)
        if self.pooler_type == 'avg_top2':
            return masked_mean_pool(
                attention_mask, (hidden_states[-2], hidden_states[-1]), halve=True)
        raise NotImplementedError


if __name__ == "__main__":
    key = jax.random.PRNGKey(0)

    B, S, H = 2, 8, 32          # small synthetic shapes: batch=2, seq=8, hidden=32
    n_layers = 3                # enough "layers" for first/last and top-2 branches

    keys = jax.random.split(key, n_layers)
    hidden_states = tuple(
        jax.random.normal(keys[i], (B, S, H), dtype=jnp.float32)
        for i in range(n_layers))
    last_hidden = hidden_states[-1]

    # Variable-length attention mask (row 0: 8 tokens, row 1: 5 tokens).
    lengths = jnp.array([8, 5], dtype=jnp.int32)
    attention_mask = (jnp.arange(S)[None, :] < lengths[:, None]).astype(jnp.int32)

    outputs = SimpleNamespace(
        last_hidden_state=last_hidden,
        pooler_output=last_hidden[:, 0],
        hidden_states=hidden_states,
    )

    # Pure-JAX references mirroring the PyTorch formulas.
    mask_f = attention_mask.astype(jnp.float32)
    denom = mask_f.sum(-1, keepdims=True)
    refs = {
        'cls': last_hidden[:, 0],
        'cls_before_pooler': last_hidden[:, 0],
        'avg': (last_hidden * mask_f[:, :, None]).sum(1) / denom,
        'avg_first_last':
            ((hidden_states[0] + hidden_states[-1]) / 2.0
             * mask_f[:, :, None]).sum(1) / denom,
        'avg_top2':
            ((hidden_states[-2] + hidden_states[-1]) / 2.0
             * mask_f[:, :, None]).sum(1) / denom,
    }

    for ptype, ref in refs.items():
        pooler = Pooler(ptype)
        out = jax.block_until_ready(pooler(attention_mask, outputs))
        assert out.shape == ref.shape, (ptype, out.shape, ref.shape)
        err = float(jnp.max(jnp.abs(out - ref)))
        # The denominator is now an exact division; the tolerance only covers
        # the MXU's multi-pass handling of f32 matmul operands (expected error
        # ~1e-6, bounded by ~few e-3 even at single-bf16-pass input rounding).
        assert err < 1e-2, (ptype, err)

    print("KERNEL_OK")
</pallas_src>

<mosaic_0001>
module attributes {stable_mosaic.version = 11 : i64} {
  func.func @_masked_mean_kernel(%arg0: i32, %arg1: i32, %arg2: memref<2x1x8xi32, #tpu.memory_space<vmem>>, %arg3: memref<2x8x32xf32, #tpu.memory_space<vmem>>, %arg4: memref<2x1x32xf32, #tpu.memory_space<vmem>>, %arg5: memref<2x1x32xf32, #tpu.memory_space<vmem>>, %arg6: memref<2x1x1xf32, #tpu.memory_space<vmem>>) attributes {dimension_semantics = [#tpu.dimension_semantics<parallel>, #tpu.dimension_semantics<arbitrary>], iteration_bounds = array<i64: 1, 1>, scalar_prefetch = 0 : i64, scratch_operands = 2 : i64, tpu.core_type = #tpu.core_type<tc>, window_params = [{transform_indices = @transform_0, window_bounds = array<i64: 2, 1, 8>}, {transform_indices = @transform_1, window_bounds = array<i64: 2, 8, 32>}, {transform_indices = @transform_2, window_bounds = array<i64: 2, 1, 32>}]} {
    %c0_i32 = arith.constant 0 : i32
    %0 = arith.cmpi eq, %arg1, %c0_i32 : i32
    %1 = arith.extui %0 : i1 to i32
    %c0_i32_0 = arith.constant 0 : i32
    %2 = arith.cmpi ne, %1, %c0_i32_0 : i32
    scf.if %2 {
      %cst_21 = arith.constant 0.000000e+00 : f32
      %19 = vector.broadcast %cst_21 : f32 to vector<2x1x32xf32>
      %c0_22 = arith.constant 0 : index
      %c0_23 = arith.constant 0 : index
      %c0_24 = arith.constant 0 : index
      %20 = vector.load %arg5[%c0_22, %c0_23, %c0_24] : memref<2x1x32xf32, #tpu.memory_space<vmem>>, vector<2x1x32xf32>
      tpu.vector_store %arg5[%c0_22, %c0_23, %c0_24], %19 {strides = array<i32>} : memref<2x1x32xf32, #tpu.memory_space<vmem>>, vector<2x1x32xf32>,
      %cst_25 = arith.constant 0.000000e+00 : f32
      %21 = vector.broadcast %cst_25 : f32 to vector<2x1x1xf32>
      %c0_26 = arith.constant 0 : index
      %c0_27 = arith.constant 0 : index
      %c0_28 = arith.constant 0 : index
      %22 = vector.load %arg6[%c0_26, %c0_27, %c0_28] : memref<2x1x1xf32, #tpu.memory_space<vmem>>, vector<2x1x1xf32>
      tpu.vector_store %arg6[%c0_26, %c0_27, %c0_28], %21 {strides = array<i32>} : memref<2x1x1xf32, #tpu.memory_space<vmem>>, vector<2x1x1xf32>,
    } else {
    }
    %c0 = arith.constant 0 : index
    %c0_1 = arith.constant 0 : index
    %c0_2 = arith.constant 0 : index
    %3 = vector.load %arg3[%c0, %c0_1, %c0_2] : memref<2x8x32xf32, #tpu.memory_space<vmem>>, vector<2x8x32xf32>
    %c0_3 = arith.constant 0 : index
    %c0_4 = arith.constant 0 : index
    %c0_5 = arith.constant 0 : index
    %4 = vector.load %arg2[%c0_3, %c0_4, %c0_5] : memref<2x1x8xi32, #tpu.memory_space<vmem>>, vector<2x1x8xi32>
    %c0_6 = arith.constant 0 : index
    %c0_7 = arith.constant 0 : index
    %c0_8 = arith.constant 0 : index
    %5 = vector.load %arg6[%c0_6, %c0_7, %c0_8] : memref<2x1x1xf32, #tpu.memory_space<vmem>>, vector<2x1x1xf32>
    %6 = arith.sitofp %4 : vector<2x1x8xi32> to vector<2x1x8xf32>
    %cst = arith.constant dense<0.000000e+00> : vector<2x1xf32>
    %7 = vector.multi_reduction <add>, %6, %cst [2] : vector<2x1x8xf32> to vector<2x1xf32>
    %8 = vector.shape_cast %7 : vector<2x1xf32> to vector<2x1x1xf32>
    %9 = arith.addf %5, %8 : vector<2x1x1xf32>
    %c0_9 = arith.constant 0 : index
    %c0_10 = arith.constant 0 : index
    %c0_11 = arith.constant 0 : index
    %10 = vector.load %arg6[%c0_9, %c0_10, %c0_11] : memref<2x1x1xf32, #tpu.memory_space<vmem>>, vector<2x1x1xf32>
    tpu.vector_store %arg6[%c0_9, %c0_10, %c0_11], %9 {strides = array<i32>} : memref<2x1x1xf32, #tpu.memory_space<vmem>>, vector<2x1x1xf32>,
    %c0_12 = arith.constant 0 : index
    %c0_13 = arith.constant 0 : index
    %c0_14 = arith.constant 0 : index
    %11 = vector.load %arg5[%c0_12, %c0_13, %c0_14] : memref<2x1x32xf32, #tpu.memory_space<vmem>>, vector<2x1x32xf32>
    %12 = arith.sitofp %4 : vector<2x1x8xi32> to vector<2x1x8xf32>
    "tpu.trace_start"() <{level = 10 : i32, message = "bqs,bsh->bqh"}> : () -> ()
    %cst_15 = arith.constant dense<0.000000e+00> : vector<2x1x32xf32>
    %13 = tpu.matmul %12, %3, %cst_15 {dimension_numbers = #tpu.dot_dimension_numbers<[2], [1], [1], [2], [0, 0, 0, 1, 1, 2], [0], [0]>} : vector<2x1x8xf32>, vector<2x8x32xf32>, vector<2x1x32xf32> -> vector<2x1x32xf32>
    "tpu.trace_stop"() : () -> ()
    %14 = arith.addf %11, %13 : vector<2x1x32xf32>
    %c0_16 = arith.constant 0 : index
    %c0_17 = arith.constant 0 : index
    %c0_18 = arith.constant 0 : index
    %15 = vector.load %arg5[%c0_16, %c0_17, %c0_18] : memref<2x1x32xf32, #tpu.memory_space<vmem>>, vector<2x1x32xf32>
    tpu.vector_store %arg5[%c0_16, %c0_17, %c0_18], %14 {strides = array<i32>} : memref<2x1x32xf32, #tpu.memory_space<vmem>>, vector<2x1x32xf32>,
    %c0_i32_19 = arith.constant 0 : i32
    %16 = arith.cmpi eq, %arg1, %c0_i32_19 : i32
    %17 = arith.extui %16 : i1 to i32
    %c0_i32_20 = arith.constant 0 : i32
    %18 = arith.cmpi ne, %17, %c0_i32_20 : i32
    scf.if %18 {
      %c0_21 = arith.constant 0 : index
      %c0_22 = arith.constant 0 : index
      %c0_23 = arith.constant 0 : index
      %19 = vector.load %arg6[%c0_21, %c0_22, %c0_23] : memref<2x1x1xf32, #tpu.memory_space<vmem>>, vector<2x1x1xf32>
      %cst_24 = arith.constant 1.000000e+00 : f32
      %20 = vector.broadcast %cst_24 : f32 to vector<2x1x1xf32>
      %21 = arith.divf %20, %19 : vector<2x1x1xf32>
      %c0_25 = arith.constant 0 : index
      %c0_26 = arith.constant 0 : index
      %c0_27 = arith.constant 0 : index
      %22 = vector.load %arg5[%c0_25, %c0_26, %c0_27] : memref<2x1x32xf32, #tpu.memory_space<vmem>>, vector<2x1x32xf32>
      %23 = vector.broadcast %21 : vector<2x1x1xf32> to vector<2x1x32xf32>
      %24 = arith.mulf %22, %23 : vector<2x1x32xf32>
      %c0_28 = arith.constant 0 : index
      %c0_29 = arith.constant 0 : index
      %c0_30 = arith.constant 0 : index
      %25 = vector.load %arg4[%c0_28, %c0_29, %c0_30] : memref<2x1x32xf32, #tpu.memory_space<vmem>>, vector<2x1x32xf32>
      tpu.vector_store %arg4[%c0_28, %c0_29, %c0_30], %24 {strides = array<i32>} : memref<2x1x32xf32, #tpu.memory_space<vmem>>, vector<2x1x32xf32>,
    } else {
    }
    return
  }
  func.func @transform_0(%arg0: i32, %arg1: i32) -> (i32, i32, i32) {
    %c0_i32 = arith.constant 0 : i32
    %c0_i32_0 = arith.constant 0 : i32
    return %arg0, %c0_i32, %arg1 : i32, i32, i32
  }
  func.func @transform_1(%arg0: i32, %arg1: i32) -> (i32, i32, i32) {
    %c0_i32 = arith.constant 0 : i32
    %c0_i32_0 = arith.constant 0 : i32
    return %arg0, %arg1, %c0_i32 : i32, i32, i32
  }
  func.func @transform_2(%arg0: i32, %arg1: i32) -> (i32, i32, i32) {
    %c0_i32 = arith.constant 0 : i32
    %c0_i32_0 = arith.constant 0 : i32
    %c0_i32_1 = arith.constant 0 : i32
    return %arg0, %c0_i32, %c0_i32_0 : i32, i32, i32
  }
}

</mosaic_0001>

<bundles_post_ra>
// kernel: tpu_custom_call.1
= control target key start
LH: loop header
LB: loop body
LE: loop exit
PB: predicated region body
PF: predicated region fallthrough
CT: control target
= control target key end

     0   :  { %7 = vsyncpa [#allocation5], 0  ;;  %s423_s0 = inlined_call_operand.hbm [shape: s32[2,1,8], index: 0, kind: input, shape index: {}]   ;;  %s424_s1 = inlined_call_operand.hbm [shape: f32[2,8,32], index: 1, kind: input, shape index: {}]   ;;  %s425_s2 = inlined_call_operand.hbm [shape: f32[2,1,32], index: 2, kind: output, shape index: {}]  }
   0x1   :  { %8 = vsyncpa [#allocation8], 0 }
   0x2   :  { %9 = vsyncpa [#allocation6], 0  ;;  %s373_s9 = smov [#allocation4]  }
   0x3   :  { %s15_s10 = sshll.u32 %s373_s9, 4  ;;  %s16_s10 = int_to_ptr.vmem [resolvable:$true] %s15_s10 }
   0x4   :  { %s315_s11 = scalar_lea.vmem %s16_s10, 32  ;;  %p320_p1 = scmp.lt.s32.totalorder %s16_s10, %s16_s10 }
   0x5   :  { %p316_p0 = scmp.ne.s32.totalorder %s16_s10, %s315_s11  ;;  %p321_p2 = scmp.lt.s32.totalorder %s315_s11, %s315_s11 }
   0x7   :  { %p322_p3 = por %p321_p2, %p320_p1 }
   0x9   :  { %p323_p4 = pnand %p322_p3, %p316_p0 }
   0xb   :  { %326 = shalt.err (!%p323_p4)
}
   0xc   :  { %s374_s12 = smov 16   ;;  %s375_s13 = smov 1  }
   0xd   :  { %21 = dma.hbm_to_vmem [thread:$0]  %s423_s0, 32, %s16_s10, [#allocation5], %s374_s12, %s374_s12, %s375_s13  }
   0xe   :  { %s376_s16 = smov [#allocation7]  }
   0xf   :  { %s27_s17 = sshll.u32 %s376_s16, 4  ;;  %s28_s17 = int_to_ptr.vmem [resolvable:$true] %s27_s17 }
  0x10   :  { %s335_s18 = scalar_lea.vmem %s28_s17, 256  ;;  %p340_p6 = scmp.lt.s32.totalorder %s28_s17, %s28_s17 }
  0x11   :  { %p336_p5 = scmp.ne.s32.totalorder %s28_s17, %s335_s18  ;;  %p341_p7 = scmp.lt.s32.totalorder %s335_s18, %s335_s18 }
  0x13   :  { %p342_p8 = por %p341_p7, %p340_p6 }
  0x15   :  { %p343_p9 = pnand %p342_p8, %p336_p5 }
  0x17   :  { %346 = shalt.err (!%p343_p9)
}
  0x18   :  { %s377_s19 = smov 128   ;;  %s378_s20 = smov 8  }
  0x19   :  { %33 = dma.hbm_to_vmem [thread:$0]  %s424_s1, 256, %s28_s17, [#allocation8], %s377_s19, %s377_s19, %s378_s20  }
  0x1a   :  { %367 = dma.done.wait [#allocation5], 32  }
  0x1b   :  { %368 = vsyncadd [#allocation5], 4294967264 }
  0x1c   :  { %369 = dma.done.wait [#allocation8], 256  }
  0x1d   :  { %370 = vsyncadd [#allocation8], 4294967040  ;;  %v379_v0 = vmov 0.0   ;;  %vm380_vm0 = vmmov 0   ;;  %vm47_vm1 = vcmask 0   ;;  %vm58_vm2 = vcmask 57344  }
  0x1e   :  { %281 = vmatprep.subr.mxu0 %v379_v0  ;;  %283 = vmatprep.mubr.msk.f32.mxu0 %vm380_vm0, %v379_v0  ;;  %48 = vst.msk [vmem:[#allocation3] sm:$0x1] %vm47_vm1, %v379_v0  ;;  %49 = vst.msk [vmem:[#allocation3 + $0x1] sm:$0x1] %vm47_vm1, %v379_v0  ;;  %v52_v1 = vld [vmem:[#allocation4] sm:$0x1]  ;;  %v240_v28 = vlaneseq }
  0x1f   :  { %286 = vmatprep.subr.mxu1 %v379_v0  ;;  %288 = vmatprep.mubr.msk.f32.mxu1 %vm380_vm0, %v379_v0  ;;  %v53_v2 = vld [vmem:[#allocation4 + $0x1] sm:$0x1]  ;;  %v50_v3 = vld [vmem:[#allocation7] sm:$0xff]  ;;  %vm72_vm3 = vcmask 64512   ;;  %v56_v4 = vcvt.s32.f32 %v52_v1  ;;  %v51_v6 = vld [vmem:[#allocation7 + $0x8] sm:$0xff]  ;;  %v381_v9 = vmov 0  }
  0x20   :  { %v57_v5 = vcvt.s32.f32 %v53_v2  ;;  %282 = vmatpush3.msra.mxu0 %v50_v3  ;;  %287 = vmatpush3.msra.mxu1 %v51_v6  ;;  %vm44_vm4 = vcmask 253952   ;;  %v241_v29 = vshrl.u32 %v240_v28, 7  ;;  %s382_s0 = smov [#allocation9]  }
  0x21   :  { %v59_v7 = vsel %vm58_vm2, %v56_v4, 0.0  ;;  %284 = vmatmul.mubr.msk.f32.vlgmr.msra.gmra.mxu0 %vm72_vm3, %v56_v4  ;;  %301 = vset.pattern.permute.xlu1 %v381_v9  ;;  %45 = vst.msk [vmem:[#allocation2] sm:$0x1] %vm44_vm4, %v379_v0  ;;  %46 = vst.msk [vmem:[#allocation2 + $0x1] sm:$0x1] %vm44_vm4, %v379_v0  ;;  %s262_s1 = sshll.u32 %s382_s0, 4  ;;  %s263_s1 = int_to_ptr.vmem [resolvable:$true] %s262_s1 }
  0x22   :  { %289 = vmatmul.mubr.msk.f32.vlgmr.msra.gmra.mxu1 %vm72_vm3, %v57_v5  ;;  %60 = vadd.xlane.f32.xlu0 %v59_v7  ;;  %v62_v8 = vsel %vm58_vm2, %v57_v5, 0.0  ;;  %v242_v30 = vsub.s32 0, %v241_v29  ;;  %s347_s23 = scalar_lea.vmem %s263_s1, 32  ;;  %p352_p11 = scmp.lt.s32.totalorder %s263_s1, %s263_s1 }
  0x23   :  { %302 = vset.pattern.permute.xlu0 %v381_v9  ;;  %p348_p10 = scmp.ne.s32.totalorder %s263_s1, %s347_s23  ;;  %p353_p12 = scmp.lt.s32.totalorder %s347_s23, %s347_s23 }
  0x25   :  { %v54_v10 = vld [vmem:[#allocation3] sm:$0x1]  ;;  %v55_v13 = vld [vmem:[#allocation3 + $0x1] sm:$0x1]  ;;  %p354_p13 = por %p353_p12, %p352_p11 }
  0x26   :  { %63 = vadd.xlane.f32.xlu0 %v62_v8 }
  0x27   :  { %p355_p0 = pnand %p354_p13, %p348_p10 }
  0x28   :  { %v70_v20 = vld [vmem:[#allocation2] sm:$0x1]  ;;  %v71_v21 = vld [vmem:[#allocation2 + $0x1] sm:$0x1] }
  0xab   :  { %v61_v11 = vpop.xlane.xlu0 %60 }
  0xac   :  { %v65_v12 = vadd.f32 %v61_v11, %v54_v10 }
  0xae   :  { %68 = vst.msk [vmem:[#allocation3] sm:$0x1] %vm47_vm1, %v65_v12 }
  0xaf   :  { %v64_v14 = vpop.xlane.xlu0 %63 }
  0xb0   :  { %v66_v15 = vadd.f32 %v64_v14, %v55_v13 }
  0xb2   :  { %69 = vst.msk [vmem:[#allocation3 + $0x1] sm:$0x1] %vm47_vm1, %v66_v15 }
  0xb5   :  { %v227_v16 = vld [vmem:[#allocation3] sm:$0x1] }
  0xb6   :  { %303 = vrcp.f32 %v227_v16 }
  0xb9   :  { %v228_v17 = vld [vmem:[#allocation3 + $0x1] sm:$0x1] }
  0xba   :  { %305 = vrcp.f32 %v228_v17 }
  0xc3   :  { %v304_v18 = vpop.eup %303 }
  0xc4   :  { %237 = vperm.xlu1 %301, %v304_v18  }
  0xc7   :  { %v306_v19 = vpop.eup %305 }
  0xc8   :  { %246 = vperm.xlu1 %301, %v306_v19  }
  0xe1   :  { %v142_v22 = vpop.f32.mrf.mxu0 }
  0xe2   :  { %v215_v23 = vpop.f32.mrf.mxu1  ;;  %v219_v24 = vadd.f32 %v142_v22, %v70_v20 }
  0xe3   :  { %v220_v25 = vadd.f32 %v215_v23, %v71_v21  ;;  %v285_v26 = vpop.f32.mrf.mxu0 }
  0xe4   :  { %v290_v27 = vpop.f32.mrf.mxu1  ;;  %222 = vst.msk [vmem:[#allocation2] sm:$0x1] %vm44_vm4, %v219_v24 }
  0xe5   :  { %223 = vst.msk [vmem:[#allocation2 + $0x1] sm:$0x1] %vm44_vm4, %v220_v25 }
  0xeb   :  { %v233_v32 = vld [vmem:[#allocation2] sm:$0x1] }
  0xec   :  { %v234_v36 = vld [vmem:[#allocation2 + $0x1] sm:$0x1] }
 0x13f   :  { %v238_v31 = vpop.permute.xlu1 %237 }
 0x140   :  { %v243_v33 = vrot.slane %v238_v31, %v242_v30 }
 0x142   :  { %v253_v34 = vmul.f32 %v243_v33, %v233_v32 }
 0x143   :  { %v247_v35 = vpop.permute.xlu1 %246 }
 0x144   :  { %255 = vst.msk [vmem:[#allocation9] sm:$0x1] %vm44_vm4, %v253_v34  ;;  %v252_v37 = vrot.slane %v247_v35, %v242_v30 }
 0x146   :  { %v254_v38 = vmul.f32 %v252_v37, %v234_v36 }
 0x148   :  { %256 = vst.msk [vmem:[#allocation9 + $0x1] sm:$0x1] %vm44_vm4, %v254_v38 }
 0x149   :  { %358 = shalt.err (!%p355_p0)
}
 0x14a   :  { %268 = dma.vmem_to_hbm [thread:$0]  %s263_s1, 32, %s425_s2, [#allocation6], %s374_s12, %s374_s12, %s375_s13  }
 0x14b   :  { %371 = dma.done.wait [#allocation6], 32  }
 0x14c   :  { %372 = vsyncadd [#allocation6], 4294967264 }
 0x14d   :  { %272 = vsyncpa [#allocation5], 1 }
 0x14e   :  { %273 = vsyncpa [#allocation8], 1 }
 0x14f   :  { %274 = vsyncpa [#allocation6], 1 }

</bundles_post_ra>
